<compile_context>
chip_gen: v7x
topology: tpu7x:2x2x1
jax: 0.10.0
libtpu: 0.0.40
codegen_flags: <defaults>
</compile_context>

<pallas_src>
import jax
import jax.numpy as jnp
from jax.experimental import pallas as pl
from jax.experimental.pallas import tpu as pltpu


def _mask_kernel(idx_ref, scal_ref, img_ref, sal_ref, out_ref):
    # idx_ref : SMEM (1,)  int32  -- selected channel (consumed by index_maps only)
    # scal_ref: SMEM (2,)  f32    -- [global_min, 1/(global_max - global_min)]
    # sal_ref : VMEM (T, 128)     -- saliency tile (channel picked by index_map)
    # img_ref : VMEM (C_img, T, 128)
    # out_ref : VMEM (C_img, T, 128)
    del idx_ref
    mn = scal_ref[0]
    scale = scal_ref[1]
    normed = (sal_ref[...].astype(jnp.float32) - mn) * scale          # (T, 128)
    out_ref[...] = (img_ref[...].astype(jnp.float32)
                    * normed[None, :, :]).astype(out_ref.dtype)


def _choose_row_tile(total_rows, c_img, itemsize, target_bytes=1 << 20):
    """Pick the sublane-row tile (units of 128-lane rows) for the img/out blocks."""
    if total_rows % 8 != 0:
        # (8,128) rule: a non-multiple-of-8 block is only legal at full extent.
        return total_rows
    best = 8
    for t in range(8, total_rows + 1, 8):
        if total_rows % t == 0 and c_img * t * 128 * itemsize <= target_bytes:
            best = t
    return best


def get_mask(activations, img1, index):
    """Pallas implementation of GetMask.forward(img1, index)."""
    B, C_act, H, W = activations.shape
    Bi, C_img, Hi, Wi = img1.shape
    assert (B, H, W) == (Bi, Hi, Wi)
    HW = H * W
    assert HW % 128 == 0, "flattened spatial axis must be a multiple of 128"
    rows = HW // 128                                  # 128-lane rows per image

    idx = jnp.asarray(index, dtype=jnp.int32).reshape((1,))

    # Global min/max of the selected channel, hoisted out of the kernel.
    # XLA fuses the dynamic slice into the reductions (no full copy written back).
    sal_sel = jax.lax.dynamic_slice_in_dim(activations, idx[0], 1, axis=1)  # [B,1,H,W]
    mn = jnp.min(sal_sel).astype(jnp.float32)
    mx = jnp.max(sal_sel).astype(jnp.float32)
    scale = jnp.float32(1.0) / (mx - mn)   # constant channel -> inf -> NaN, like torch
    scalars = jnp.stack([mn, scale])       # (2,) f32 -> SMEM

    # Lane/sublane-dense layouts: last two dims (rows, 128).
    act_r = activations.reshape(B, C_act, rows, 128)
    img_r = img1.reshape(B, C_img, rows, 128)

    img_itemsize = jnp.dtype(img1.dtype).itemsize
    act_itemsize = jnp.dtype(activations.dtype).itemsize
    t_rows = _choose_row_tile(rows, C_img, img_itemsize)
    n_hw_tiles = rows // t_rows

    # index_maps receive (b, t, idx_ref) -- the scalar-prefetch ref is positional.
    img_spec = pl.BlockSpec((pl.Squeezed(), C_img, t_rows, 128),
                            lambda b, t, idx_ref: (b, 0, t, 0))
    sal_spec = pl.BlockSpec((pl.Squeezed(), pl.Squeezed(), t_rows, 128),
                            lambda b, t, idx_ref: (b, idx_ref[0], t, 0))
    out_spec = pl.BlockSpec((pl.Squeezed(), C_img, t_rows, 128),
                            lambda b, t, idx_ref: (b, 0, t, 0))
    scal_spec = pl.BlockSpec(memory_space=pltpu.MemorySpace.SMEM)

    # Exact padded VMEM need: double-buffered img in/out blocks + saliency block.
    pad_rows = -(-t_rows // 8) * 8
    img_blk = C_img * pad_rows * 128 * img_itemsize
    sal_blk = pad_rows * 128 * act_itemsize
    need = 2 * img_blk + 2 * img_blk + 2 * sal_blk
    try:
        vmem_cap = pltpu.get_tpu_info().vmem_capacity_bytes
    except Exception:
        vmem_cap = 64 * 1024 * 1024
    vmem_limit = int(min(int(0.75 * vmem_cap),
                         max(int(1.25 * need), 4 * 1024 * 1024)))

    out = pl.pallas_call(
        _mask_kernel,
        out_shape=jax.ShapeDtypeStruct((B, C_img, rows, 128), img1.dtype),
        grid_spec=pltpu.PrefetchScalarGridSpec(
            num_scalar_prefetch=1,
            grid=(B, n_hw_tiles),
            in_specs=[scal_spec, img_spec, sal_spec],
            out_specs=out_spec,
        ),
        compiler_params=pltpu.CompilerParams(
            dimension_semantics=("parallel", "parallel"),
            vmem_limit_bytes=vmem_limit,
        ),
    )(idx, scalars, img_r, act_r)
    return out.reshape(B, C_img, H, W)


def get_mask_ref(activations, img1, index):
    """Pure-JAX reference mirroring the PyTorch forward."""
    sal = activations[:, index, :, :][:, None, :, :]
    normed = (sal - sal.min()) / (sal.max() - sal.min())
    return img1 * normed


if __name__ == "__main__":
    key = jax.random.PRNGKey(0)
    k_act, k_img, k_act2, k_img2 = jax.random.split(key, 4)

    # Primary small test (module-consistent shapes).
    B, C_act, C_img, H, W = 2, 4, 3, 16, 16
    activations = jax.random.normal(k_act, (B, C_act, H, W), dtype=jnp.float32)
    img1 = jax.random.normal(k_img, (B, C_img, H, W), dtype=jnp.float32)
    index = 2

    out = jax.block_until_ready(get_mask(activations, img1, index))
    ref = get_mask_ref(activations, img1, index)
    assert out.shape == (B, C_img, H, W)
    assert jnp.allclose(out, ref, atol=1e-5, rtol=1e-5)

    # Secondary check exercising the multiple-of-8 sublane tile path.
    B2, H2, W2 = 2, 32, 32
    act2 = jax.random.normal(k_act2, (B2, C_act, H2, W2), dtype=jnp.float32)
    img2 = jax.random.normal(k_img2, (B2, C_img, H2, W2), dtype=jnp.float32)
    out2 = jax.block_until_ready(get_mask(act2, img2, 1))
    ref2 = get_mask_ref(act2, img2, 1)
    assert jnp.allclose(out2, ref2, atol=1e-5, rtol=1e-5)

    print("KERNEL_OK")
</pallas_src>

<mosaic_0001>
module attributes {stable_mosaic.version = 11 : i64} {
  func.func @_mask_kernel(%arg0: i32, %arg1: i32, %arg2: memref<1xi32, #tpu.memory_space<smem>>, %arg3: memref<2xf32, #tpu.memory_space<smem>>, %arg4: memref<1x3x2x128xf32, #tpu.memory_space<vmem>>, %arg5: memref<1x1x2x128xf32, #tpu.memory_space<vmem>>, %arg6: memref<1x3x2x128xf32, #tpu.memory_space<vmem>>) attributes {dimension_semantics = [#tpu.dimension_semantics<parallel>, #tpu.dimension_semantics<parallel>], iteration_bounds = array<i64: 2, 1>, scalar_prefetch = 1 : i64, scratch_operands = 0 : i64, tpu.core_type = #tpu.core_type<tc>, window_params = [{transform_indices = @transform_0, window_bounds = array<i64: 2>}, {transform_indices = @transform_1, window_bounds = array<i64: 1, 3, 2, 128>}, {transform_indices = @transform_2, window_bounds = array<i64: 1, 1, 2, 128>}, {transform_indices = @transform_3, window_bounds = array<i64: 1, 3, 2, 128>}]} {
    %c0 = arith.constant 0 : index
    %0 = memref.load %arg3[%c0] : memref<2xf32, #tpu.memory_space<smem>>
    %c1 = arith.constant 1 : index
    %1 = memref.load %arg3[%c1] : memref<2xf32, #tpu.memory_space<smem>>
    %c0_0 = arith.constant 0 : index
    %c0_1 = arith.constant 0 : index
    %c0_2 = arith.constant 0 : index
    %c0_3 = arith.constant 0 : index
    %2 = vector.load %arg5[%c0_0, %c0_1, %c0_2, %c0_3] : memref<1x1x2x128xf32, #tpu.memory_space<vmem>>, vector<1x1x2x128xf32>
    %3 = vector.shape_cast %2 : vector<1x1x2x128xf32> to vector<2x128xf32>
    %4 = vector.broadcast %0 : f32 to vector<2x128xf32>
    %5 = arith.subf %3, %4 : vector<2x128xf32>
    %6 = vector.broadcast %1 : f32 to vector<2x128xf32>
    %7 = arith.mulf %5, %6 : vector<2x128xf32>
    %c0_4 = arith.constant 0 : index
    %c0_5 = arith.constant 0 : index
    %c0_6 = arith.constant 0 : index
    %c0_7 = arith.constant 0 : index
    %8 = vector.load %arg4[%c0_4, %c0_5, %c0_6, %c0_7] : memref<1x3x2x128xf32, #tpu.memory_space<vmem>>, vector<1x3x2x128xf32>
    %9 = vector.shape_cast %8 : vector<1x3x2x128xf32> to vector<3x2x128xf32>
    %10 = vector.shape_cast %7 : vector<2x128xf32> to vector<1x2x128xf32>
    %11 = vector.broadcast %10 : vector<1x2x128xf32> to vector<3x2x128xf32>
    %12 = arith.mulf %9, %11 : vector<3x2x128xf32>
    %c0_8 = arith.constant 0 : index
    %c0_9 = arith.constant 0 : index
    %c0_10 = arith.constant 0 : index
    %c0_11 = arith.constant 0 : index
    %13 = vector.load %arg6[%c0_8, %c0_9, %c0_10, %c0_11] : memref<1x3x2x128xf32, #tpu.memory_space<vmem>>, vector<1x3x2x128xf32>
    %14 = vector.shape_cast %13 : vector<1x3x2x128xf32> to vector<3x2x128xf32>
    %15 = vector.shape_cast %12 : vector<3x2x128xf32> to vector<1x3x2x128xf32>
    tpu.vector_store %arg6[%c0_8, %c0_9, %c0_10, %c0_11], %15 {strides = array<i32>} : memref<1x3x2x128xf32, #tpu.memory_space<vmem>>, vector<1x3x2x128xf32>,
    return
  }
  func.func @transform_0(%arg0: i32, %arg1: i32, %arg2: memref<1xi32, #tpu.memory_space<smem>>) -> i32 {
    %c0_i32 = arith.constant 0 : i32
    %c0_i32_0 = arith.constant 0 : i32
    return %c0_i32 : i32
  }
  func.func @transform_1(%arg0: i32, %arg1: i32, %arg2: memref<1xi32, #tpu.memory_space<smem>>) -> (i32, i32, i32, i32) {
    %c0_i32 = arith.constant 0 : i32
    %c0_i32_0 = arith.constant 0 : i32
    %c0_i32_1 = arith.constant 0 : i32
    return %arg0, %c0_i32, %arg1, %c0_i32_0 : i32, i32, i32, i32
  }
  func.func @transform_2(%arg0: i32, %arg1: i32, %arg2: memref<1xi32, #tpu.memory_space<smem>>) -> (i32, i32, i32, i32) {
    %c0 = arith.constant 0 : index
    %0 = memref.load %arg2[%c0] : memref<1xi32, #tpu.memory_space<smem>>
    %c0_i32 = arith.constant 0 : i32
    %c0_i32_0 = arith.constant 0 : i32
    return %arg0, %0, %arg1, %c0_i32 : i32, i32, i32, i32
  }
  func.func @transform_3(%arg0: i32, %arg1: i32, %arg2: memref<1xi32, #tpu.memory_space<smem>>) -> (i32, i32, i32, i32) {
    %c0_i32 = arith.constant 0 : i32
    %c0_i32_0 = arith.constant 0 : i32
    %c0_i32_1 = arith.constant 0 : i32
    return %arg0, %c0_i32, %arg1, %c0_i32_0 : i32, i32, i32, i32
  }
}

</mosaic_0001>

<bundles_post_ra>
// kernel: tpu_custom_call.1
= control target key start
LH: loop header
LB: loop body
LE: loop exit
PB: predicated region body
PF: predicated region fallthrough
CT: control target
= control target key end

     0   :  { %s1078_s0 = inlined_call_operand.<no memory space> [shape: s32[1], index: 0, kind: input, shape index: {}]   ;;  %s1079_s1 = inlined_call_operand.vmem [shape: f32[2], index: 1, kind: input, shape index: {}]   ;;  %s1080_s2 = inlined_call_operand.hbm [shape: f32[2,3,2,128], index: 2, kind: input, shape index: {}]   ;;  %s1081_s3 = inlined_call_operand.hbm [shape: f32[2,4,2,128], index: 3, kind: input, shape index: {}]   ;;  %s1082_s4 = inlined_call_operand.hbm [shape: f32[2,3,2,128], index: 4, kind: output, shape index: {}]  }
   0x1   :  { %1091 = sst [smem:[#allocation18_spill]] %s1079_s1 }
   0x2   :  { %1092 = sst [smem:[#allocation19_spill]] %s1080_s2 }
   0x3   :  { %9 = sst [smem:[#allocation3]] %s1078_s0 }
   0x4   :  { %10 = vsyncpa [#allocation7], 0 }
   0x5   :  { %11 = vsyncpa [#allocation5], 0 }
   0x6   :  { %13 = vsyncpa [#allocation5 + $0x1], 0 }
   0x7   :  { %14 = vsyncpa [#allocation10], 0 }
   0x8   :  { %16 = vsyncpa [#allocation10 + $0x1], 0 }
   0x9   :  { %17 = vsyncpa [#allocation6], 0 }
   0xa   :  { %19 = vsyncpa [#allocation6 + $0x1], 0  ;;  %s777_s17 = smov 0   ;;  %s779_s18 = smov 0  }
   0xb   :  { %s781_s19 = smov 0   ;;  %s783_s20 = smov 0  }
   0xc   :  { %s785_s21 = smov 0   ;;  %s787_s22 = smov 0  }
   0xd   :  { %s789_s0 = smov 0   ;;  %s791_s23 = smov 0  }
   0xe   :  { %s793_s24 = smov 0  }
   0xf LB: > { %s424_s25 = sadd.s32 4294967295, %s739_s24   ;;  %s425_s26 = sadd.s32 4294967294, %s739_s24   ;;  %s739_s24 = sphi %s793_s24, %s25_s24   ;;  %s735_s23 = sphi %s791_s23, %s1126_s23   ;;  %s731_s0 = sphi %s789_s0, %s1125_s0   ;;  %s727_s22 = sphi %s787_s22, %s1124_s22   ;;  %s723_s21 = sphi %s785_s21, %s1123_s21   ;;  %s719_s20 = sphi %s783_s20, %s1122_s20   ;;  %s715_s19 = sphi %s781_s19, %s1121_s19   ;;  %s711_s18 = sphi %s779_s18, %s1120_s18   ;;  %s707_s17 = sphi %s777_s17, %s1119_s17  }
  0x10   : > { %p80_p0 = scmp.ne.s32.totalorder %s723_s21, %s719_s20  ;;  %p826_p1 = scmp.eq.s32.totalorder %s424_s25, 0 }
  0x11   : > { %p830_p2 = scmp.eq.s32.totalorder %s424_s25, 1  ;;  %p144_p3 = scmp.eq.s32.totalorder %s425_s26, 1 }
  0x12   : > { %p836_p4 = por %p826_p1, %p80_p0  ;;  %p426_p5 = scmp.ge.s32.totalorder %s739_s24, 1 }
  0x13   : > { %p841_p6 = por %p144_p3, %p80_p0  ;;  %p151_p7 = scmp.lt.s32.totalorder %s739_s24, 3 }
  0x14   : > { %s1095_s29 = scalar_select %p836_p4, 1, 0 }
  0x15   : > { %s1096_s30 = scalar_select %p841_p6, 1, 0 }
  0x16   : > { %s1097_s1 = sld [smem:[#allocation18_spill]]  ;;  %p849_p8 = pnand %p426_p5, %p151_p7 }
  0x17   : > { %s37_s10 = sadd.s32 1, %s735_s23  ;;  %s67_s11 = sadd.s32 1, %s727_s22 }
  0x18   : > { %s1098_s8 = scalar_select %p849_p8, 1, 0 }
  0x19   : > { %p454_p10 = pneg %p849_p8  ;;  %p39_p12 = scmp.ge.s32.totalorder %s37_s10, 2 }
  0x1b   : > { %p858_p11 = pnand %p454_p10, %p826_p1 }
  0x1c   : > { %s164_s7 = sshll.u32 %s1097_s1, 4  ;;  %s165_s7 = int_to_ptr.vmem [resolvable:$true] %s164_s7 }
  0x1d   : > { %s550_s12 = scalar_lea.vmem %s165_s7, 16  ;;  %p552_p0 = pneg %p858_p11 }
  0x1e   : > { %p551_p13 = scmp.ne.s32.totalorder %s165_s7, %s550_s12  ;;  %p558_p7 = scmp.lt.s32.totalorder %s165_s7, %s165_s7 }
  0x1f   : > { %p559_p6 = scmp.lt.s32.totalorder %s550_s12, %s550_s12 }
  0x20   : > { %p553_p3 = pnand %p552_p0, %p551_p13 }
  0x21   : > { %p560_p9 = por %p559_p6, %p558_p7 }
  0x22   : > { %p554_p5 = pneg %p553_p3 }
  0x24   : > { %p561_p4 = pnand %p560_p9, %p554_p5 }
  0x26   : > { %564 = shalt.err (!%p561_p4)
}
  0x27   : > { %s741_s13 = smov [#allocation4]   ;;  %s1128_s10 = smov (%p39_p12, %s37_s10), 0 }
  0x28   : > { %457 = dma.vmem_to_smem (!%p858_p11), %s165_s7, 16, %s741_s13, [#allocation7]  }
  0x29   : > { %1100 = sst [smem:[#allocation16_spill]] %s1128_s10  ;;  %p74_p6 = scmp.ne.s32.totalorder %s727_s22, %s723_s21 }
  0x2a   : > { %p1086_p4 = scmp.eq.s32.totalorder %s739_s24, 0  ;;  %s62_s14 = ssub.s32 %s735_s23, %s1128_s10 }
  0x2b   : > { %p1085_p9 = scmp.lt.s32.totalorder %s739_s24, 2  ;;  %p876_p10 = scmp.eq.s32.totalorder %s62_s14, 0 }
  0x2c   : > { %p76_p13 = por %p1086_p4, %p74_p6  ;;  %p884_p0 = por %p830_p2, %p74_p6 }
  0x2d   : > { %s1101_s15 = scalar_select %p876_p10, 1, 0 }
  0x2e   : > { %s1102_s16 = scalar_select %p884_p0, 1, 0 }
  0x2f   : > { %s175_s25 = sand.u32 1, %s727_s22   ;;  %s441_s6 = smul.u32 96, %s735_s23 }
  0x30   : > { %s892_s26 = scalar_select %p876_p10, %s727_s22, %s67_s11  }
  0x31   : > { %s440_s5 = smul.u32 6, %s175_s25  ;;  %p897_p11 = pnand %p1085_p9, %p76_p13 }
  0x32   : > { %1103 = sst [smem:[#allocation17_spill]] %s892_s26  ;;  %s1105_s2 = sld [smem:[#allocation19_spill]] }
  0x33   : > { %s179_s11 = scalar_lea.vmem [#allocation8], %s440_s5  ;;  %s908_s14 = scalar_lea.sflag [#allocation5], %s175_s25 }
  0x34   : > { %s187_s13 = sshll.u32 %s179_s11, 4  ;;  %p567_p12 = pneg %p897_p11  ;;  %s906_s13 = int_to_ptr.vmem [resolvable:$true] %s187_s13 }
  0x38   : > { %s904_s28 = scalar_lea.hbm %s1105_s2, %s441_s6  ;;  %s570_s12 = scalar_lea.hbm %s1105_s2, 192 }
  0x39   : > { %s565_s1 = scalar_lea.hbm %s904_s28, 96  ;;  %p571_p7 = scmp.lt.u32.totalorder %s904_s28, %s1105_s2 }
  0x3a   : > { %p566_p2 = scmp.ne.s32.totalorder %s904_s28, %s565_s1  ;;  %p572_p6 = scmp.lt.u32.totalorder %s570_s12, %s565_s1 }
  0x3b   : > { %p574_p9 = scmp.lt.u32.totalorder %s565_s1, %s904_s28 }
  0x3c   : > { %p568_p3 = pnand %p567_p12, %p566_p2  ;;  %p573_p13 = por %p572_p6, %p571_p7 }
  0x3e   : > { %p569_p5 = pneg %p568_p3  ;;  %p575_p4 = por %p574_p9, %p573_p13 }
  0x40   : > { %p576_p0 = pnand %p575_p4, %p569_p5 }
  0x42   : > { %579 = shalt.err (!%p576_p0)
}
  0x43   : > { %s580_s25 = scalar_lea.vmem %s906_s13, 96  ;;  %s742_s5 = smov [#allocation8]  }
  0x44   : > { %p581_p2 = scmp.ne.s32.totalorder %s906_s13, %s580_s25  ;;  %s585_s11 = sshll.u32 %s742_s5, 4  ;;  %s586_s11 = int_to_ptr.vmem [resolvable:$false] %s585_s11 }
  0x45   : > { %s587_s10 = scalar_lea.vmem %s586_s11, 192  ;;  %p588_p10 = scmp.lt.s32.totalorder %s906_s13, %s586_s11 }
  0x46   : > { %p583_p3 = pnand %p581_p2, %p567_p12  ;;  %p589_p7 = scmp.lt.s32.totalorder %s587_s10, %s580_s25 }
  0x48   : > { %p584_p8 = pneg %p583_p3  ;;  %p590_p6 = por %p589_p7, %p588_p10 }
  0x4a   : > { %p591_p9 = pnand %p590_p6, %p584_p8 }
  0x4c   : > { %594 = shalt.err (!%p591_p9)
}
  0x4d   : > { %s743_s1 = smov 32   ;;  %s744_s26 = smov 2  }
  0x4e   : > { %461 = dma.hbm_to_vmem [thread:$0]  (!%p897_p11), %s904_s28, 96, %s906_s13, %s908_s14, %s743_s1, %s743_s1, %s744_s26  }
  0x4f   : > { %s90_s6 = sld [smem:[#allocation3]]  ;;  %s99_s9 = sadd.s32 1, %s715_s19 }
  0x50   : > { %p106_p8 = scmp.ne.s32.totalorder %s715_s19, %s711_s18  ;;  %p112_p4 = scmp.ne.s32.totalorder %s711_s18, %s707_s17 }
  0x51   : > { %s197_s12 = sand.u32 1, %s715_s19   ;;  %p1106_p10 = scmp.eq.s32.totalorder %s739_s24, 0 }
  0x52   : > { %p946_p12 = por %p112_p4, %p826_p1  ;;  %s430_s5 = sshll.u32 %s197_s12, 1 }
  0x53   : > { %p108_p0 = por %p106_p8, %p1106_p10  ;;  %s431_s11 = sshll.u32 %s735_s23, 2 }
  0x54   : > { %s1107_s25 = scalar_select %p946_p12, 1, 0 }
  0x55   : > { %s208_s10 = sadd.s32 %s431_s11, %s90_s6  ;;  %s201_s17 = scalar_lea.vmem [#allocation9], %s430_s5 }
  0x56   : > { %s432_s7 = sshll.u32 %s208_s10, 5  ;;  %s212_s14 = sshll.u32 %s201_s17, 4  ;;  %s967_s14 = int_to_ptr.vmem [resolvable:$true] %s212_s14 }
  0x57   : > { %s954_s13 = scalar_lea.hbm %s1081_s3, %s432_s7  ;;  %p1108_p11 = scmp.lt.s32.totalorder %s739_s24, 2 }
  0x58   : > { %p1110_p13 = scmp.ne.s32.totalorder %s1101_s15, 0  ;;  %s198_s2 = scalar_lea.sflag [#allocation10], %s197_s12 }
  0x59   : > { %p958_p5 = pnand %p1108_p11, %p108_p0  ;;  %s595_s6 = scalar_lea.hbm %s954_s13, 32 }
  0x5a   : > { %s965_s26 = scalar_select %p1110_p13, %s715_s19, %s99_s9  }
  0x5b   : > { %p596_p2 = scmp.ne.s32.totalorder %s954_s13, %s595_s6  ;;  %p597_p3 = pneg %p958_p5 }
  0x5c   : > { %s600_s10 = scalar_lea.hbm %s1081_s3, 256  ;;  %p601_p9 = scmp.lt.u32.totalorder %s954_s13, %s1081_s3 }
  0x5d   : > { %p598_p7 = pnand %p597_p3, %p596_p2  ;;  %p602_p8 = scmp.lt.u32.totalorder %s600_s10, %s595_s6 }
  0x5e   : > { %p604_p10 = scmp.lt.u32.totalorder %s595_s6, %s954_s13 }
  0x5f   : > { %p599_p6 = pneg %p598_p7  ;;  %p603_p4 = por %p602_p8, %p601_p9 }
  0x61   : > { %p605_p0 = por %p604_p10, %p603_p4 }
  0x63   : > { %p606_p11 = pnand %p605_p0, %p599_p6 }
  0x65   : > { %609 = shalt.err (!%p606_p11)
}
  0x66   : > { %s610_s9 = scalar_lea.vmem %s967_s14, 32  ;;  %s745_s12 = smov [#allocation9]  }
  0x67   : > { %p611_p13 = scmp.ne.s32.totalorder %s967_s14, %s610_s9  ;;  %s615_s28 = sshll.u32 %s745_s12, 4  ;;  %s616_s28 = int_to_ptr.vmem [resolvable:$false] %s615_s28 }
  0x68   : > { %s617_s17 = scalar_lea.vmem %s616_s28, 64  ;;  %p618_p12 = scmp.lt.s32.totalorder %s967_s14, %s616_s28 }
  0x69   : > { %p613_p2 = pnand %p611_p13, %p597_p3  ;;  %p619_p9 = scmp.lt.s32.totalorder %s617_s17, %s610_s9 }
  0x6b   : > { %p614_p7 = pneg %p613_p2  ;;  %p620_p8 = por %p619_p9, %p618_p12 }
  0x6d   : > { %p621_p4 = pnand %p620_p8, %p614_p7 }
  0x6f   : > { %624 = shalt.err (!%p621_p4)
}
  0x70   : > { %464 = dma.hbm_to_vmem [thread:$0]  (!%p958_p5), %s954_s13, 32, %s967_s14, %s198_s2  }
  0x71   : > { %p1111_p6 = scmp.ne.s32.totalorder %s1098_s8, 0 }
  0x73   : > { %221 = sbr.rel (%p1111_p6) target bundleno = 163 (0xa3), region = 32 }
  0x7a   : > { %690 = dma.done.wait (%p826_p1), [#allocation7], 16  }
  0x7b   : > { %692 = vsyncadd (%p826_p1), [#allocation7], 4294967280  ;;  %s1001_s6 = sand.u32 1, %s723_s21   ;;  %p1112_p12 = scmp.ne.s32.totalorder %s1095_s29, 0 }
  0x7c   : > { %s442_s5 = smul.u32 6, %s1001_s6  ;;  %s228_s1 = scalar_lea.sflag [#allocation5], %s1001_s6 }
  0x7e   : > { %s231_s11 = scalar_lea.vmem [#allocation8], %s442_s5 }
  0x7f   : > { %694 = dma.done.wait (%p1112_p12), %s228_s1, 96  }
  0x80   : > { %696 = vsyncadd (%p1112_p12), %s228_s1, 4294967200  ;;  %s236_s8 = sand.u32 1, %s711_s18   ;;  %p1113_p1 = scmp.ne.s32.totalorder %s1107_s25, 0 }
  0x81   : > { %s435_s13 = sshll.u32 %s236_s8, 1  ;;  %s237_s27 = scalar_lea.sflag [#allocation10], %s236_s8 }
  0x82   : > { %s240_s14 = scalar_lea.vmem [#allocation9], %s435_s13 }
  0x83   : > { %698 = dma.done.wait (%p1113_p1), %s237_s27, 32  }
  0x84   : > { %700 = vsyncadd (%p1113_p1), %s237_s27, 4294967264 }
  0x85   : > { %245 = sfence }
  0x86   : > { %s270_s2 = sld [smem:[#allocation4]]  ;;  %s436_s10 = sld [smem:[#allocation4 + $0x1]]  ;;  %v272_v0 = vld [vmem:[%s240_s14] sm:$0x3]  ;;  %v277_v4 = vld [vmem:[%s231_s11] sm:$0x3] }
  0x87   : > { %s268_s15 = scalar_lea.vmem [#allocation11], %s442_s5  ;;  %s443_s7 = smul.u32 96, %s731_s0  ;;  %v278_v5 = vld [vmem:[%s231_s11 + $0x2] sm:$0x3]  ;;  %v279_v6 = vld [vmem:[%s231_s11 + $0x4] sm:$0x3] }
  0x88   : > { %s301_s29 = sshll.u32 %s268_s15, 4  ;;  %s287_s0 = scalar_lea.sflag [#allocation6], %s1001_s6  ;;  %s1015_s29 = int_to_ptr.vmem [resolvable:$true] %s301_s29 }
  0x89   : > { %s1020_s12 = scalar_lea.hbm %s1082_s4, %s443_s7  ;;  %s625_s28 = scalar_lea.vmem %s1015_s29, 96 }
  0x8a   : > { %p626_p5 = scmp.ne.s32.totalorder %s1015_s29, %s625_s28  ;;  %p1114_p3 = scmp.ne.s32.totalorder %s1102_s16, 0 }
  0x8b   : > { %s746_s17 = smov [#allocation11]  }
  0x8c   : > { %v273_v1 = vstv %s270_s2  ;;  %v275_v3 = vstv %s436_s10  ;;  %p627_p10 = pnand %p626_p5, %p1114_p3  ;;  %s629_s5 = sshll.u32 %s746_s17, 4  ;;  %s630_s5 = int_to_ptr.vmem [resolvable:$false] %s629_s5 }
  0x8d   : > { %v274_v2 = vsub.f32 %v272_v0, %v273_v1  ;;  %s631_s1 = scalar_lea.vmem %s630_s5, 192  ;;  %p632_p11 = scmp.lt.s32.totalorder %s1015_s29, %s630_s5 }
  0x8e   : > { %p628_p0 = pneg %p627_p10  ;;  %p633_p13 = scmp.lt.s32.totalorder %s631_s1, %s625_s28 }
  0x8f   : > { %v276_v7 = vmul.f32 %v275_v3, %v274_v2 }
  0x90   : > { %p634_p2 = por %p633_p13, %p632_p11 }
  0x91   : > { %v280_v8 = vmul.f32 %v277_v4, %v276_v7  ;;  %v281_v9 = vmul.f32 %v278_v5, %v276_v7  ;;  %v282_v10 = vmul.f32 %v279_v6, %v276_v7 }
  0x92   : > { %p635_p7 = pnand %p634_p2, %p628_p0 }
  0x93   : > { %283 = vst [vmem:[%s268_s15] sm:$0x3] %v280_v8  ;;  %284 = vst [vmem:[%s268_s15 + $0x2] sm:$0x3] %v281_v9 }
  0x94   : > { %285 = vst [vmem:[%s268_s15 + $0x4] sm:$0x3] %v282_v10 }
  0x95   : > { %638 = shalt.err (!%p635_p7)
}
  0x96   : > { %s639_s11 = scalar_lea.hbm %s1020_s12, 96  ;;  %s643_s27 = scalar_lea.hbm %s1082_s4, 192 }
  0x97   : > { %p640_p9 = scmp.ne.s32.totalorder %s1020_s12, %s639_s11  ;;  %p644_p6 = scmp.lt.u32.totalorder %s1020_s12, %s1082_s4 }
  0x98   : > { %p645_p12 = scmp.lt.u32.totalorder %s643_s27, %s639_s11  ;;  %p647_p5 = scmp.lt.u32.totalorder %s639_s11, %s1020_s12 }
  0x99   : > { %p641_p8 = pnand %p640_p9, %p1114_p3 }
  0x9a   : > { %p646_p1 = por %p645_p12, %p644_p6 }
  0x9b   : > { %p642_p4 = pneg %p641_p8 }
  0x9c   : > { %p648_p10 = por %p647_p5, %p646_p1 }
  0x9e   : > { %p649_p0 = pnand %p648_p10, %p642_p4 }
  0xa0   : > { %652 = shalt.err (!%p649_p0)
}
  0xa1   : > { %s747_s10 = smov 32   ;;  %s748_s15 = smov 2  }
  0xa2   : > { %452 = dma.vmem_to_hbm [thread:$0]  (%p1114_p3), %s1015_s29, 96, %s1020_s12, %s287_s0, %s747_s10, %s747_s10, %s748_s15  }
  0xa3 PF: > { %s316_s7 = sand.u32 1, %s719_s20   ;;  %p1115_p11 = scmp.ne.s32.totalorder %s1096_s30, 0 }
  0xa4   : > { %p1116_p13 = scmp.ge.s32.totalorder %s739_s24, 2  ;;  %s317_s25 = scalar_lea.sflag [#allocation6], %s316_s7 }
  0xa6   : > { %p466_p2 = pnand %p1116_p13, %p1115_p11 }
  0xa8   : > { %702 = dma.done.wait (!%p466_p2), %s317_s25, 96  }
  0xa9   : > { %704 = vsyncadd (!%p466_p2), %s317_s25, 4294967200  ;;  %s25_s24 = sadd.s32 1, %s739_s24   ;;  %s1117_s16 = sld [smem:[#allocation17_spill]] }
  0xaa   : > { %p22_p7 = scmp.ge.s32.totalorder %s25_s24, 4   ;;  %s1118_s6 = sld [smem:[#allocation16_spill]] }
  0xab   : > { %s1119_s17 = smov %s711_s18  ;;  %s1120_s18 = smov %s715_s19 }
  0xac   : > { %s1121_s19 = smov %s965_s26  ;;  %s1122_s20 = smov %s723_s21 }
  0xad   : > { %s1123_s21 = smov %s727_s22  ;;  %s1125_s0 = smov %s735_s23 }
  0xae   :  { %24 = sbr.rel (!%p22_p7) target bundleno = 15 (0xf), region = 95 }
  0xaf   : > { %s1124_s22 = smov %s1117_s16 }
  0xb0   : > { %s1126_s23 = smov %s1118_s6 }
  0xb5   :  { %322 = vsyncpa [#allocation5], 1 }
  0xb6   :  { %324 = vsyncpa [#allocation5 + $0x1], 1 }
  0xb7   :  { %325 = vsyncpa [#allocation10], 1 }
  0xb8   :  { %327 = vsyncpa [#allocation10 + $0x1], 1 }
  0xb9   :  { %328 = vsyncpa [#allocation6], 1 }
  0xba   :  { %330 = vsyncpa [#allocation6 + $0x1], 1 }
  0xbb   :  { %331 = vsyncpa [#allocation7], 1 }
  0xbc   :  { %333 = vsyncpa [#allocation7 + $0x1], 1 }

</bundles_post_ra>
